<compile_context>
chip_gen: v5e
topology: v5e:2x2
jax: 0.10.0
libtpu: 0.0.40
codegen_flags: <defaults>
</compile_context>

<pallas_src>
import functools

import jax
import jax.numpy as jnp
from jax.experimental import pallas as pl
from jax.experimental.pallas import tpu as pltpu

LN_EPS = 1e-5  # torch.nn.LayerNorm default


def _round_up(n, m):
    return ((n + m - 1) // m) * m


def _cdiv(a, b):
    return (a + b - 1) // b


def _vmem_capacity_bytes():
    try:
        cap = int(pltpu.get_tpu_info().vmem_capacity_bytes)
        if cap >= (32 << 20):
            return cap
    except Exception:
        pass
    return 64 << 20  # conservative (v7x size); v5e/v6e have 128 MiB


def mlp_kernel(x_ref, w1_ref, b1_ref, gw2_ref, s_ref, c_ref, o_ref, acc_ref,
               *, num_hiddens):
    k = pl.program_id(1)

    @pl.when(k == 0)
    def _():
        acc_ref[...] = jnp.zeros_like(acc_ref)

    # ---- Linear 1, K-blocked: native/bf16 MXU operands, f32 accumulation ----
    acc_ref[...] += jnp.dot(x_ref[...], w1_ref[...],
                            preferred_element_type=jnp.float32)

    @pl.when(k == pl.num_programs(1) - 1)
    def _():
        # Bias + ReLU.  Padded hidden columns (zero W1 cols, zero b1) stay 0.
        h = jnp.maximum(acc_ref[...] + b1_ref[...], 0.0)            # (R, H) f32

        # LayerNorm statistics over the *true* hidden width; padded h cols are 0
        # so both reductions are already correct without a mask.
        inv_h = 1.0 / num_hiddens
        mean = jnp.sum(h, axis=-1, keepdims=True) * inv_h            # (R, 1)
        var = jnp.sum(h * h, axis=-1, keepdims=True) * inv_h - mean * mean
        var = jnp.maximum(var, 0.0)                                  # guard cancellation

        # Fused LayerNorm-affine + (H -> 1) projection:
        #   out = rsqrt(var+eps) * (sum(h*gw2) - mean*sum(gw2)) + (beta.w2 + b2)
        p = jnp.sum(h * gw2_ref[...], axis=-1, keepdims=True)        # (R, 1)
        out = (p - mean * s_ref[...]) * jax.lax.rsqrt(var + LN_EPS) + c_ref[...]

        # Lane-dense store: (R, 1) -> (R,) -> (1, 1, R).
        o_ref[...] = out.reshape(-1).reshape(1, 1, -1).astype(o_ref.dtype)


def mlp_forward(x, params, *, max_row_tile=256, max_tk=None, use_bf16_matmul=False):
    """x: [..., num_inputs] -> [..., 1]  (nn.Sequential(Linear, ReLU, LayerNorm, Linear))."""
    w1, b1, gamma, beta, w2, b2 = params
    num_inputs = x.shape[-1]
    num_hiddens = w1.shape[1]

    lead_shape = x.shape[:-1]
    x2d = x.reshape(-1, num_inputs)
    n_rows = x2d.shape[0]

    f32 = jnp.float32
    h_pad = _round_up(num_hiddens, 128)

    # ---- Row tiling: no row padding.  Small inputs -> one full-extent block;
    # large inputs -> >= 2 tiles (v7x megacore) on a cdiv grid.
    if n_rows <= 128:
        row_tile = max(n_rows, 1)
    else:
        row_tile = min(max_row_tile, _round_up(_cdiv(n_rows, 2), 8))
    n_tiles = _cdiv(n_rows, row_tile)

    # ---- MXU ingestion dtype (optionally bf16 on v6e/v7x; accumulation is f32).
    mm_dtype = x2d.dtype
    if use_bf16_matmul and mm_dtype == jnp.float32:
        mm_dtype = jnp.bfloat16
    item_mm = jnp.dtype(mm_dtype).itemsize

    # ---- K tiling: bound W1's VMEM residency from the detected VMEM capacity.
    vmem_cap = _vmem_capacity_bytes()
    k_pad128 = _round_up(num_inputs, 128)
    fixed = 4 * row_tile * h_pad * 4                       # acc scratch + epilogue temps
    budget = max((vmem_cap // 2) - fixed - (4 << 20), 2 << 20)
    denom = 2 * h_pad * item_mm + 2 * row_tile * item_mm   # double-buffered W1 + x blocks
    tk_cap = max((budget // denom) // 128 * 128, 128)
    if max_tk is not None:
        tk_cap = max(min(tk_cap, _round_up(max_tk, 128)), 128)
    if tk_cap >= k_pad128:
        n_k, tk, k_pad = 1, k_pad128, k_pad128
    else:
        n_k = _cdiv(k_pad128, tk_cap)
        tk = _round_up(_cdiv(k_pad128, n_k), 128)
        k_pad = tk * n_k
    # TODO(synk): for very large num_hiddens also block the H axis (the f32
    # accumulator and W1 blocks currently keep the full h_pad width resident).

    # ---- Operand prep: only the K axis is zero padded (matmul correctness).
    x_p = x2d if k_pad == num_inputs else jnp.pad(x2d, ((0, 0), (0, k_pad - num_inputs)))
    x_p = x_p.astype(mm_dtype)
    w1_p = jnp.pad(w1, ((0, k_pad - num_inputs), (0, h_pad - num_hiddens))).astype(mm_dtype)
    b1_p = jnp.pad(b1.astype(f32), (0, h_pad - num_hiddens)).reshape(1, h_pad)

    # Fused epilogue constants: gw2 = gamma*w2, S = sum(gw2), c = beta.w2 + b2.
    w2f = w2.reshape(-1).astype(f32)
    gw2 = gamma.astype(f32) * w2f
    gw2_p = jnp.pad(gw2, (0, h_pad - num_hiddens)).reshape(1, h_pad)
    s_2d = jnp.sum(gw2).reshape(1, 1)
    c_2d = (jnp.sum(beta.astype(f32) * w2f) + b2.reshape(()).astype(f32)).reshape(1, 1)

    # ---- Scoped-VMEM budget with a generation-aware cap.
    out_item = jnp.dtype(x.dtype).itemsize
    est = (2 * row_tile * tk * item_mm          # x stream (double buffered)
           + 2 * tk * h_pad * item_mm           # W1 stream
           + row_tile * h_pad * 4               # f32 accumulator scratch
           + 3 * row_tile * h_pad * 4           # epilogue temporaries headroom
           + 2 * row_tile * out_item + 8 * h_pad * 4)
    vmem_limit = int(min(max(est + (4 << 20), 32 << 20), vmem_cap - (8 << 20)))

    kernel = functools.partial(mlp_kernel, num_hiddens=num_hiddens)

    def build(single_buffer_residents):
        res_kw = {"pipeline_mode": pl.Buffered(1)} if single_buffer_residents else {}

        def const_spec(shape):
            return pl.BlockSpec(shape, lambda i, k: (0,) * len(shape), **res_kw)

        if n_k == 1:
            w1_spec = const_spec((tk, h_pad))            # fetched once, single buffer
        else:
            w1_spec = pl.BlockSpec((tk, h_pad), lambda i, k: (k, 0))  # streamed over K

        return pl.pallas_call(
            kernel,
            out_shape=jax.ShapeDtypeStruct((n_tiles, 1, row_tile), x.dtype),
            grid_spec=pltpu.PrefetchScalarGridSpec(
                num_scalar_prefetch=0,
                grid=(n_tiles, n_k),
                in_specs=[
                    pl.BlockSpec((row_tile, tk), lambda i, k: (i, k)),  # x row/K tile
                    w1_spec,                                            # W1
                    const_spec((1, h_pad)),                             # b1
                    const_spec((1, h_pad)),                             # gamma*w2
                    const_spec((1, 1)),                                 # sum(gamma*w2)
                    const_spec((1, 1)),                                 # beta.w2 + b2
                ],
                out_specs=pl.BlockSpec((1, 1, row_tile), lambda i, k: (i, 0, 0)),
                scratch_shapes=[pltpu.VMEM((row_tile, h_pad), jnp.float32)],
            ),
            compiler_params=pltpu.CompilerParams(
                dimension_semantics=("parallel", "arbitrary"),
                vmem_limit_bytes=vmem_limit,
            ),
        )

    args = (x_p, w1_p, b1_p, gw2_p, s_2d, c_2d)
    try:
        out_tiles = build(True)(*args)
    except Exception:
        # Fallback if single-buffered residents are rejected by this jax/Mosaic build.
        out_tiles = build(False)(*args)

    out_flat = out_tiles.reshape(-1)[:n_rows]
    return out_flat.reshape(*lead_shape, 1)


def init_params(key, num_inputs, num_hiddens, dtype=jnp.float32):
    k1, k2, k3, k4 = jax.random.split(key, 4)
    lim1 = 1.0 / jnp.sqrt(num_inputs)
    lim2 = 1.0 / jnp.sqrt(num_hiddens)
    w1 = jax.random.uniform(k1, (num_inputs, num_hiddens), dtype, -lim1, lim1)
    b1 = jax.random.uniform(k2, (num_hiddens,), dtype, -lim1, lim1)
    gamma = jnp.ones((num_hiddens,), dtype)   # LayerNorm weight default
    beta = jnp.zeros((num_hiddens,), dtype)   # LayerNorm bias default
    w2 = jax.random.uniform(k3, (num_hiddens, 1), dtype, -lim2, lim2)
    b2 = jax.random.uniform(k4, (1,), dtype, -lim2, lim2)
    return (w1, b1, gamma, beta, w2, b2)


def mlp_reference(x, params):
    w1, b1, gamma, beta, w2, b2 = params
    h = jnp.maximum(x @ w1 + b1, 0.0)
    mean = jnp.mean(h, axis=-1, keepdims=True)
    var = jnp.mean((h - mean) ** 2, axis=-1, keepdims=True)
    hn = (h - mean) / jnp.sqrt(var + LN_EPS) * gamma + beta
    return hn @ w2 + b2


if __name__ == "__main__":
    key = jax.random.PRNGKey(0)
    kx, kp, kx2, kp3, kx3 = jax.random.split(key, 5)

    # Test 1: toy shapes (feature padding 32 -> 128, 64 -> 128; one 16-row tile).
    batch, seq, num_inputs, num_hiddens = 2, 8, 32, 64
    x = jax.random.normal(kx, (batch, seq, num_inputs), dtype=jnp.float32)
    params = init_params(kp, num_inputs, num_hiddens)
    out = jax.block_until_ready(mlp_forward(x, params))
    ref = mlp_reference(x, params)
    assert out.shape == (batch, seq, 1), out.shape
    assert jnp.allclose(out, ref, atol=1e-4, rtol=1e-4), \
        float(jnp.max(jnp.abs(out - ref)))

    # Test 2: multiple row tiles (320 rows -> 2 tiles of 160), no row padding.
    x2 = jax.random.normal(kx2, (2, 160, num_inputs), dtype=jnp.float32)
    out2 = jax.block_until_ready(mlp_forward(x2, params))
    ref2 = mlp_reference(x2, params)
    assert out2.shape == (2, 160, 1), out2.shape
    assert jnp.allclose(out2, ref2, atol=1e-4, rtol=1e-4), \
        float(jnp.max(jnp.abs(out2 - ref2)))

    # Test 3: K-reduction grid axis (384 inputs forced into 3 K-tiles of 128).
    params3 = init_params(kp3, 384, num_hiddens)
    x3 = jax.random.normal(kx3, (4, 8, 384), dtype=jnp.float32)
    out3 = jax.block_until_ready(mlp_forward(x3, params3, max_tk=128))
    ref3 = mlp_reference(x3, params3)
    assert out3.shape == (4, 8, 1), out3.shape
    assert jnp.allclose(out3, ref3, atol=5e-4, rtol=5e-4), \
        float(jnp.max(jnp.abs(out3 - ref3)))

    # Test 4: bf16 MXU ingestion path (v6e/v7x fast path) — smoke test.
    out4 = jax.block_until_ready(mlp_forward(x, params, use_bf16_matmul=True))
    assert out4.shape == (batch, seq, 1), out4.shape
    assert bool(jnp.all(jnp.isfinite(out4)))

    print("KERNEL_OK")
</pallas_src>

<mosaic_0001>
module attributes {stable_mosaic.version = 11 : i64} {
  func.func @mlp_kernel(%arg0: i32, %arg1: i32, %arg2: memref<16x128xf32, #tpu.memory_space<vmem>>, %arg3: memref<128x128xf32, #tpu.memory_space<vmem>>, %arg4: memref<1x128xf32, #tpu.memory_space<vmem>>, %arg5: memref<1x128xf32, #tpu.memory_space<vmem>>, %arg6: memref<1x1xf32, #tpu.memory_space<vmem>>, %arg7: memref<1x1xf32, #tpu.memory_space<vmem>>, %arg8: memref<1x1x16xf32, #tpu.memory_space<vmem>>, %arg9: memref<16x128xf32, #tpu.memory_space<vmem>>) attributes {dimension_semantics = [#tpu.dimension_semantics<parallel>, #tpu.dimension_semantics<arbitrary>], iteration_bounds = array<i64: 1, 1>, scalar_prefetch = 0 : i64, scratch_operands = 1 : i64, tpu.core_type = #tpu.core_type<tc>, window_params = [{transform_indices = @transform_0, window_bounds = array<i64: 16, 128>}, {pipeline_mode = #tpu.pipeline_mode<synchronous>, transform_indices = @transform_1, window_bounds = array<i64: 128, 128>}, {pipeline_mode = #tpu.pipeline_mode<synchronous>, transform_indices = @transform_2, window_bounds = array<i64: 1, 128>}, {pipeline_mode = #tpu.pipeline_mode<synchronous>, transform_indices = @transform_3, window_bounds = array<i64: 1, 128>}, {pipeline_mode = #tpu.pipeline_mode<synchronous>, transform_indices = @transform_4, window_bounds = array<i64: 1, 1>}, {pipeline_mode = #tpu.pipeline_mode<synchronous>, transform_indices = @transform_5, window_bounds = array<i64: 1, 1>}, {transform_indices = @transform_6, window_bounds = array<i64: 1, 1, 16>}]} {
    %c0_i32 = arith.constant 0 : i32
    %0 = arith.cmpi eq, %arg1, %c0_i32 : i32
    %1 = arith.extui %0 : i1 to i32
    %c0_i32_0 = arith.constant 0 : i32
    %2 = arith.cmpi ne, %1, %c0_i32_0 : i32
    scf.if %2 {
      %cst_10 = arith.constant 0.000000e+00 : f32
      %12 = vector.broadcast %cst_10 : f32 to vector<16x128xf32>
      %c0_11 = arith.constant 0 : index
      %c0_12 = arith.constant 0 : index
      %13 = vector.load %arg9[%c0_11, %c0_12] : memref<16x128xf32, #tpu.memory_space<vmem>>, vector<16x128xf32>
      tpu.vector_store %arg9[%c0_11, %c0_12], %12 {strides = array<i32>} : memref<16x128xf32, #tpu.memory_space<vmem>>, vector<16x128xf32>,
    } else {
    }
    %c0 = arith.constant 0 : index
    %c0_1 = arith.constant 0 : index
    %3 = vector.load %arg9[%c0, %c0_1] : memref<16x128xf32, #tpu.memory_space<vmem>>, vector<16x128xf32>
    %c0_2 = arith.constant 0 : index
    %c0_3 = arith.constant 0 : index
    %4 = vector.load %arg2[%c0_2, %c0_3] : memref<16x128xf32, #tpu.memory_space<vmem>>, vector<16x128xf32>
    %c0_4 = arith.constant 0 : index
    %c0_5 = arith.constant 0 : index
    %5 = vector.load %arg3[%c0_4, %c0_5] : memref<128x128xf32, #tpu.memory_space<vmem>>, vector<128x128xf32>
    %cst = arith.constant dense<0.000000e+00> : vector<16x128xf32>
    %6 = tpu.matmul %4, %5, %cst {dimension_numbers = #tpu.dot_dimension_numbers<[1], [0], [0], [1], [0, 0, 1, 1], [], []>} : vector<16x128xf32>, vector<128x128xf32>, vector<16x128xf32> -> vector<16x128xf32>
    %7 = arith.addf %3, %6 : vector<16x128xf32>
    %c0_6 = arith.constant 0 : index
    %c0_7 = arith.constant 0 : index
    %8 = vector.load %arg9[%c0_6, %c0_7] : memref<16x128xf32, #tpu.memory_space<vmem>>, vector<16x128xf32>
    tpu.vector_store %arg9[%c0_6, %c0_7], %7 {strides = array<i32>} : memref<16x128xf32, #tpu.memory_space<vmem>>, vector<16x128xf32>,
    %c0_i32_8 = arith.constant 0 : i32
    %9 = arith.cmpi eq, %arg1, %c0_i32_8 : i32
    %10 = arith.extui %9 : i1 to i32
    %c0_i32_9 = arith.constant 0 : i32
    %11 = arith.cmpi ne, %10, %c0_i32_9 : i32
    scf.if %11 {
      %c0_10 = arith.constant 0 : index
      %c0_11 = arith.constant 0 : index
      %12 = vector.load %arg9[%c0_10, %c0_11] : memref<16x128xf32, #tpu.memory_space<vmem>>, vector<16x128xf32>
      %c0_12 = arith.constant 0 : index
      %c0_13 = arith.constant 0 : index
      %13 = vector.load %arg4[%c0_12, %c0_13] : memref<1x128xf32, #tpu.memory_space<vmem>>, vector<1x128xf32>
      %14 = vector.broadcast %13 : vector<1x128xf32> to vector<16x128xf32>
      %15 = arith.addf %12, %14 : vector<16x128xf32>
      %cst_14 = arith.constant 0.000000e+00 : f32
      %16 = vector.broadcast %cst_14 : f32 to vector<16x128xf32>
      %17 = arith.maximumf %15, %16 : vector<16x128xf32>
      %cst_15 = arith.constant dense<0.000000e+00> : vector<16xf32>
      %18 = vector.multi_reduction <add>, %17, %cst_15 [1] : vector<16x128xf32> to vector<16xf32>
      %19 = vector.shape_cast %18 : vector<16xf32> to vector<16x1xf32>
      %cst_16 = arith.constant 1.562500e-02 : f32
      %20 = vector.broadcast %cst_16 : f32 to vector<16x1xf32>
      %21 = arith.mulf %19, %20 : vector<16x1xf32>
      %22 = arith.mulf %17, %17 : vector<16x128xf32>
      %cst_17 = arith.constant dense<0.000000e+00> : vector<16xf32>
      %23 = vector.multi_reduction <add>, %22, %cst_17 [1] : vector<16x128xf32> to vector<16xf32>
      %24 = vector.shape_cast %23 : vector<16xf32> to vector<16x1xf32>
      %cst_18 = arith.constant 1.562500e-02 : f32
      %25 = vector.broadcast %cst_18 : f32 to vector<16x1xf32>
      %26 = arith.mulf %24, %25 : vector<16x1xf32>
      %27 = arith.mulf %21, %21 : vector<16x1xf32>
      %28 = arith.subf %26, %27 : vector<16x1xf32>
      %cst_19 = arith.constant 0.000000e+00 : f32
      %29 = vector.broadcast %cst_19 : f32 to vector<16x1xf32>
      %30 = arith.maximumf %28, %29 : vector<16x1xf32>
      %c0_20 = arith.constant 0 : index
      %c0_21 = arith.constant 0 : index
      %31 = vector.load %arg5[%c0_20, %c0_21] : memref<1x128xf32, #tpu.memory_space<vmem>>, vector<1x128xf32>
      %32 = vector.broadcast %31 : vector<1x128xf32> to vector<16x128xf32>
      %33 = arith.mulf %17, %32 : vector<16x128xf32>
      %cst_22 = arith.constant dense<0.000000e+00> : vector<16xf32>
      %34 = vector.multi_reduction <add>, %33, %cst_22 [1] : vector<16x128xf32> to vector<16xf32>
      %35 = vector.shape_cast %34 : vector<16xf32> to vector<16x1xf32>
      %c0_23 = arith.constant 0 : index
      %c0_24 = arith.constant 0 : index
      %36 = vector.load %arg6[%c0_23, %c0_24] : memref<1x1xf32, #tpu.memory_space<vmem>>, vector<1x1xf32>
      %37 = vector.broadcast %36 : vector<1x1xf32> to vector<16x1xf32>
      %38 = arith.mulf %21, %37 : vector<16x1xf32>
      %39 = arith.subf %35, %38 : vector<16x1xf32>
      %cst_25 = arith.constant 9.99999974E-6 : f32
      %40 = vector.broadcast %cst_25 : f32 to vector<16x1xf32>
      %41 = arith.addf %30, %40 : vector<16x1xf32>
      %42 = math.rsqrt %41 : vector<16x1xf32>
      %43 = arith.mulf %39, %42 : vector<16x1xf32>
      %c0_26 = arith.constant 0 : index
      %c0_27 = arith.constant 0 : index
      %44 = vector.load %arg7[%c0_26, %c0_27] : memref<1x1xf32, #tpu.memory_space<vmem>>, vector<1x1xf32>
      %45 = vector.broadcast %44 : vector<1x1xf32> to vector<16x1xf32>
      %46 = arith.addf %43, %45 : vector<16x1xf32>
      %47 = vector.shape_cast %46 : vector<16x1xf32> to vector<16xf32>
      %48 = vector.shape_cast %47 : vector<16xf32> to vector<1x1x16xf32>
      %c0_28 = arith.constant 0 : index
      %c0_29 = arith.constant 0 : index
      %c0_30 = arith.constant 0 : index
      %49 = vector.load %arg8[%c0_28, %c0_29, %c0_30] : memref<1x1x16xf32, #tpu.memory_space<vmem>>, vector<1x1x16xf32>
      tpu.vector_store %arg8[%c0_28, %c0_29, %c0_30], %48 {strides = array<i32>} : memref<1x1x16xf32, #tpu.memory_space<vmem>>, vector<1x1x16xf32>,
    } else {
    }
    return
  }
  func.func @transform_0(%arg0: i32, %arg1: i32) -> (i32, i32) {
    %c0_i32 = arith.constant 0 : i32
    return %arg0, %arg1 : i32, i32
  }
  func.func @transform_1(%arg0: i32, %arg1: i32) -> (i32, i32) {
    %c0_i32 = arith.constant 0 : i32
    %c0_i32_0 = arith.constant 0 : i32
    %c0_i32_1 = arith.constant 0 : i32
    return %c0_i32, %c0_i32_0 : i32, i32
  }
  func.func @transform_2(%arg0: i32, %arg1: i32) -> (i32, i32) {
    %c0_i32 = arith.constant 0 : i32
    %c0_i32_0 = arith.constant 0 : i32
    %c0_i32_1 = arith.constant 0 : i32
    return %c0_i32, %c0_i32_0 : i32, i32
  }
  func.func @transform_3(%arg0: i32, %arg1: i32) -> (i32, i32) {
    %c0_i32 = arith.constant 0 : i32
    %c0_i32_0 = arith.constant 0 : i32
    %c0_i32_1 = arith.constant 0 : i32
    return %c0_i32, %c0_i32_0 : i32, i32
  }
  func.func @transform_4(%arg0: i32, %arg1: i32) -> (i32, i32) {
    %c0_i32 = arith.constant 0 : i32
    %c0_i32_0 = arith.constant 0 : i32
    %c0_i32_1 = arith.constant 0 : i32
    return %c0_i32, %c0_i32_0 : i32, i32
  }
  func.func @transform_5(%arg0: i32, %arg1: i32) -> (i32, i32) {
    %c0_i32 = arith.constant 0 : i32
    %c0_i32_0 = arith.constant 0 : i32
    %c0_i32_1 = arith.constant 0 : i32
    return %c0_i32, %c0_i32_0 : i32, i32
  }
  func.func @transform_6(%arg0: i32, %arg1: i32) -> (i32, i32, i32) {
    %c0_i32 = arith.constant 0 : i32
    %c0_i32_0 = arith.constant 0 : i32
    %c0_i32_1 = arith.constant 0 : i32
    return %arg0, %c0_i32, %c0_i32_0 : i32, i32, i32
  }
}

module attributes {stable_mosaic.version = 11 : i64} {
  func.func @mlp_kernel(%arg0: i32, %arg1: i32, %arg2: memref<16x128xf32, #tpu.memory_space<vmem>>, %arg3: memref<128x128xf32, #tpu.memory_space<vmem>>, %arg4: memref<1x128xf32, #tpu.memory_space<vmem>>, %arg5: memref<1x128xf32, #tpu.memory_space<vmem>>, %arg6: memref<1x1xf32, #tpu.memory_space<vmem>>, %arg7: memref<1x1xf32, #tpu.memory_space<vmem>>, %arg8: memref<1x1x16xf32, #tpu.memory_space<vmem>>, %arg9: memref<16x128xf32, #tpu.memory_space<vmem>>) attributes {dimension_semantics = [#tpu.dimension_semantics<parallel>, #tpu.dimension_semantics<arbitrary>], iteration_bounds = array<i64: 1, 1>, scalar_prefetch = 0 : i64, scratch_operands = 1 : i64, tpu.core_type = #tpu.core_type<tc>, window_params = [{transform_indices = @transform_0, window_bounds = array<i64: 16, 128>}, {pipeline_mode = #tpu.pipeline_mode<synchronous>, transform_indices = @transform_1, window_bounds = array<i64: 128, 128>}, {pipeline_mode = #tpu.pipeline_mode<synchronous>, transform_indices = @transform_2, window_bounds = array<i64: 1, 128>}, {pipeline_mode = #tpu.pipeline_mode<synchronous>, transform_indices = @transform_3, window_bounds = array<i64: 1, 128>}, {pipeline_mode = #tpu.pipeline_mode<synchronous>, transform_indices = @transform_4, window_bounds = array<i64: 1, 1>}, {pipeline_mode = #tpu.pipeline_mode<synchronous>, transform_indices = @transform_5, window_bounds = array<i64: 1, 1>}, {transform_indices = @transform_6, window_bounds = array<i64: 1, 1, 16>}]} {
    %c0_i32 = arith.constant 0 : i32
    %0 = arith.cmpi eq, %arg1, %c0_i32 : i32
    %1 = arith.extui %0 : i1 to i32
    %c0_i32_0 = arith.constant 0 : i32
    %2 = arith.cmpi ne, %1, %c0_i32_0 : i32
    scf.if %2 {
      %cst_10 = arith.constant 0.000000e+00 : f32
      %12 = vector.broadcast %cst_10 : f32 to vector<16x128xf32>
      %c0_11 = arith.constant 0 : index
      %c0_12 = arith.constant 0 : index
      %13 = vector.load %arg9[%c0_11, %c0_12] : memref<16x128xf32, #tpu.memory_space<vmem>>, vector<16x128xf32>
      tpu.vector_store %arg9[%c0_11, %c0_12], %12 {strides = array<i32>} : memref<16x128xf32, #tpu.memory_space<vmem>>, vector<16x128xf32>,
    } else {
    }
    %c0 = arith.constant 0 : index
    %c0_1 = arith.constant 0 : index
    %3 = vector.load %arg9[%c0, %c0_1] : memref<16x128xf32, #tpu.memory_space<vmem>>, vector<16x128xf32>
    %c0_2 = arith.constant 0 : index
    %c0_3 = arith.constant 0 : index
    %4 = vector.load %arg2[%c0_2, %c0_3] : memref<16x128xf32, #tpu.memory_space<vmem>>, vector<16x128xf32>
    %c0_4 = arith.constant 0 : index
    %c0_5 = arith.constant 0 : index
    %5 = vector.load %arg3[%c0_4, %c0_5] : memref<128x128xf32, #tpu.memory_space<vmem>>, vector<128x128xf32>
    %cst = arith.constant dense<0.000000e+00> : vector<16x128xf32>
    %6 = tpu.matmul %4, %5, %cst {dimension_numbers = #tpu.dot_dimension_numbers<[1], [0], [0], [1], [0, 0, 1, 1], [], []>} : vector<16x128xf32>, vector<128x128xf32>, vector<16x128xf32> -> vector<16x128xf32>
    %7 = arith.addf %3, %6 : vector<16x128xf32>
    %c0_6 = arith.constant 0 : index
    %c0_7 = arith.constant 0 : index
    %8 = vector.load %arg9[%c0_6, %c0_7] : memref<16x128xf32, #tpu.memory_space<vmem>>, vector<16x128xf32>
    tpu.vector_store %arg9[%c0_6, %c0_7], %7 {strides = array<i32>} : memref<16x128xf32, #tpu.memory_space<vmem>>, vector<16x128xf32>,
    %c0_i32_8 = arith.constant 0 : i32
    %9 = arith.cmpi eq, %arg1, %c0_i32_8 : i32
    %10 = arith.extui %9 : i1 to i32
    %c0_i32_9 = arith.constant 0 : i32
    %11 = arith.cmpi ne, %10, %c0_i32_9 : i32
    scf.if %11 {
      %c0_10 = arith.constant 0 : index
      %c0_11 = arith.constant 0 : index
      %12 = vector.load %arg9[%c0_10, %c0_11] : memref<16x128xf32, #tpu.memory_space<vmem>>, vector<16x128xf32>
      %c0_12 = arith.constant 0 : index
      %c0_13 = arith.constant 0 : index
      %13 = vector.load %arg4[%c0_12, %c0_13] : memref<1x128xf32, #tpu.memory_space<vmem>>, vector<1x128xf32>
      %14 = vector.broadcast %13 : vector<1x128xf32> to vector<16x128xf32>
      %15 = arith.addf %12, %14 : vector<16x128xf32>
      %cst_14 = arith.constant 0.000000e+00 : f32
      %16 = vector.broadcast %cst_14 : f32 to vector<16x128xf32>
      %17 = arith.maximumf %15, %16 : vector<16x128xf32>
      %cst_15 = arith.constant dense<0.000000e+00> : vector<16xf32>
      %18 = vector.multi_reduction <add>, %17, %cst_15 [1] : vector<16x128xf32> to vector<16xf32>
      %19 = vector.shape_cast %18 : vector<16xf32> to vector<16x1xf32>
      %cst_16 = arith.constant 1.562500e-02 : f32
      %20 = vector.broadcast %cst_16 : f32 to vector<16x1xf32>
      %21 = arith.mulf %19, %20 : vector<16x1xf32>
      %22 = arith.mulf %17, %17 : vector<16x128xf32>
      %cst_17 = arith.constant dense<0.000000e+00> : vector<16xf32>
      %23 = vector.multi_reduction <add>, %22, %cst_17 [1] : vector<16x128xf32> to vector<16xf32>
      %24 = vector.shape_cast %23 : vector<16xf32> to vector<16x1xf32>
      %cst_18 = arith.constant 1.562500e-02 : f32
      %25 = vector.broadcast %cst_18 : f32 to vector<16x1xf32>
      %26 = arith.mulf %24, %25 : vector<16x1xf32>
      %27 = arith.mulf %21, %21 : vector<16x1xf32>
      %28 = arith.subf %26, %27 : vector<16x1xf32>
      %cst_19 = arith.constant 0.000000e+00 : f32
      %29 = vector.broadcast %cst_19 : f32 to vector<16x1xf32>
      %30 = arith.maximumf %28, %29 : vector<16x1xf32>
      %c0_20 = arith.constant 0 : index
      %c0_21 = arith.constant 0 : index
      %31 = vector.load %arg5[%c0_20, %c0_21] : memref<1x128xf32, #tpu.memory_space<vmem>>, vector<1x128xf32>
      %32 = vector.broadcast %31 : vector<1x128xf32> to vector<16x128xf32>
      %33 = arith.mulf %17, %32 : vector<16x128xf32>
      %cst_22 = arith.constant dense<0.000000e+00> : vector<16xf32>
      %34 = vector.multi_reduction <add>, %33, %cst_22 [1] : vector<16x128xf32> to vector<16xf32>
      %35 = vector.shape_cast %34 : vector<16xf32> to vector<16x1xf32>
      %c0_23 = arith.constant 0 : index
      %c0_24 = arith.constant 0 : index
      %36 = vector.load %arg6[%c0_23, %c0_24] : memref<1x1xf32, #tpu.memory_space<vmem>>, vector<1x1xf32>
      %37 = vector.broadcast %36 : vector<1x1xf32> to vector<16x1xf32>
      %38 = arith.mulf %21, %37 : vector<16x1xf32>
      %39 = arith.subf %35, %38 : vector<16x1xf32>
      %cst_25 = arith.constant 9.99999974E-6 : f32
      %40 = vector.broadcast %cst_25 : f32 to vector<16x1xf32>
      %41 = arith.addf %30, %40 : vector<16x1xf32>
      %42 = math.rsqrt %41 : vector<16x1xf32>
      %43 = arith.mulf %39, %42 : vector<16x1xf32>
      %c0_26 = arith.constant 0 : index
      %c0_27 = arith.constant 0 : index
      %44 = vector.load %arg7[%c0_26, %c0_27] : memref<1x1xf32, #tpu.memory_space<vmem>>, vector<1x1xf32>
      %45 = vector.broadcast %44 : vector<1x1xf32> to vector<16x1xf32>
      %46 = arith.addf %43, %45 : vector<16x1xf32>
      %47 = vector.shape_cast %46 : vector<16x1xf32> to vector<16xf32>
      %48 = vector.shape_cast %47 : vector<16xf32> to vector<1x1x16xf32>
      %c0_28 = arith.constant 0 : index
      %c0_29 = arith.constant 0 : index
      %c0_30 = arith.constant 0 : index
      %49 = vector.load %arg8[%c0_28, %c0_29, %c0_30] : memref<1x1x16xf32, #tpu.memory_space<vmem>>, vector<1x1x16xf32>
      tpu.vector_store %arg8[%c0_28, %c0_29, %c0_30], %48 {strides = array<i32>} : memref<1x1x16xf32, #tpu.memory_space<vmem>>, vector<1x1x16xf32>,
    } else {
    }
    return
  }
  func.func @transform_0(%arg0: i32, %arg1: i32) -> (i32, i32) {
    %c0_i32 = arith.constant 0 : i32
    return %arg0, %arg1 : i32, i32
  }
  func.func @transform_1(%arg0: i32, %arg1: i32) -> (i32, i32) {
    %c0_i32 = arith.constant 0 : i32
    %c0_i32_0 = arith.constant 0 : i32
    %c0_i32_1 = arith.constant 0 : i32
    return %c0_i32, %c0_i32_0 : i32, i32
  }
  func.func @transform_2(%arg0: i32, %arg1: i32) -> (i32, i32) {
    %c0_i32 = arith.constant 0 : i32
    %c0_i32_0 = arith.constant 0 : i32
    %c0_i32_1 = arith.constant 0 : i32
    return %c0_i32, %c0_i32_0 : i32, i32
  }
  func.func @transform_3(%arg0: i32, %arg1: i32) -> (i32, i32) {
    %c0_i32 = arith.constant 0 : i32
    %c0_i32_0 = arith.constant 0 : i32
    %c0_i32_1 = arith.constant 0 : i32
    return %c0_i32, %c0_i32_0 : i32, i32
  }
  func.func @transform_4(%arg0: i32, %arg1: i32) -> (i32, i32) {
    %c0_i32 = arith.constant 0 : i32
    %c0_i32_0 = arith.constant 0 : i32
    %c0_i32_1 = arith.constant 0 : i32
    return %c0_i32, %c0_i32_0 : i32, i32
  }
  func.func @transform_5(%arg0: i32, %arg1: i32) -> (i32, i32) {
    %c0_i32 = arith.constant 0 : i32
    %c0_i32_0 = arith.constant 0 : i32
    %c0_i32_1 = arith.constant 0 : i32
    return %c0_i32, %c0_i32_0 : i32, i32
  }
  func.func @transform_6(%arg0: i32, %arg1: i32) -> (i32, i32, i32) {
    %c0_i32 = arith.constant 0 : i32
    %c0_i32_0 = arith.constant 0 : i32
    %c0_i32_1 = arith.constant 0 : i32
    return %arg0, %c0_i32, %c0_i32_0 : i32, i32, i32
  }
}

</mosaic_0001>

<bundles_post_ra>
// kernel: tpu_custom_call.1
= control target key start
LH: loop header
LB: loop body
LE: loop exit
PB: predicated region body
PF: predicated region fallthrough
CT: control target
= control target key end

     0   :  { %s402_s0 = inlined_call_operand.hbm [shape: f32[16,128], index: 0, kind: input, shape index: {}]   ;;  %s403_s1 = inlined_call_operand.hbm [shape: f32[128,128], index: 1, kind: input, shape index: {}]   ;;  %s404_s2 = inlined_call_operand.vmem [shape: f32[1,128], index: 2, kind: input, shape index: {}]   ;;  %s405_s3 = inlined_call_operand.vmem [shape: f32[1,128], index: 3, kind: input, shape index: {}]   ;;  %s406_s4 = inlined_call_operand.<no memory space> [shape: f32[1,1], index: 4, kind: input, shape index: {}]   ;;  %s407_s6 = inlined_call_operand.hbm [shape: f32[1,1,16], index: 6, kind: output, shape index: {}]   ;;  %s408_s5 = inlined_call_operand.<no memory space> [shape: f32[1,1], index: 5, kind: input, shape index: {}]  }
   0x1   :  { %v11_v0 = vstv %s406_s4  ;;  %v13_v1 = vstv %s408_s5 }
   0x2   :  { %12 = vst [vmem:[#allocation3] sm:$0x1] %v11_v0 }
   0x3   :  { %14 = vst [vmem:[#allocation4] sm:$0x1] %v13_v1 }
   0x4   :  { %15 = vsyncpa [#allocation6], 0 }
   0x5   :  { %16 = vsyncpa [#allocation9], 0 }
   0x6   :  { %17 = vsyncpa [#allocation7], 0  ;;  %s22_s27 = sshll.u32 %s402_s0, 4  ;;  %s340_s28 = smov [#allocation5]   ;;  %s23_s27 = int_to_ptr.hbm [resolvable:$true] %s22_s27 }
   0x7   :  { %s24_s29 = sshll.u32 %s340_s28, 4  ;;  %s35_s4 = sshll.u32 %s403_s1, 4  ;;  %s25_s29 = int_to_ptr.vmem [resolvable:$true] %s24_s29  ;;  %s36_s4 = int_to_ptr.hbm [resolvable:$true] %s35_s4 }
   0x8   :  { %s341_s8 = smov 128   ;;  %s342_s9 = smov 8  }
   0x9   :  { %30 = dma.hbm_to_vmem [thread:$0]  %s23_s27, 256, %s25_s29, [#allocation6], %s341_s8, %s341_s8, %s342_s9  }
   0xa   :  { %s343_s5 = smov [#allocation8]  }
   0xb   :  { %s37_s10 = sshll.u32 %s343_s5, 4  ;;  %s38_s10 = int_to_ptr.vmem [resolvable:$true] %s37_s10 }
   0xc   :  { %43 = dma.hbm_to_vmem [thread:$0]  %s36_s4, 2048, %s38_s10, [#allocation9], %s341_s8, %s341_s8, %s342_s9  }
   0xd   :  { %334 = dma.done.wait [#allocation6], 256  }
   0xe   :  { %335 = vsyncadd [#allocation6], 4294967040 }
   0xf   :  { %336 = dma.done.wait [#allocation9], 2048  }
  0x10   :  { %337 = vsyncadd [#allocation9], 4294965248  ;;  %v85_v2 = vld [vmem:[#allocation8 + $0x78] sm:$0xff]  ;;  %v84_v3 = vld [vmem:[#allocation8 + $0x70] sm:$0xff]  ;;  %v344_v34 = vmov 0   ;;  %s219_s15 = sshll.u32 %s407_s6, 4  ;;  %s220_s15 = int_to_ptr.hbm [resolvable:$true] %s219_s15 }
  0x11   :  { %86 = vmatpush.msra.mxu0 %v85_v2  ;;  %230 = vmatpush.msra.mxu1 %v85_v2  ;;  %v83_v4 = vld [vmem:[#allocation8 + $0x68] sm:$0xff]  ;;  %v82_v5 = vld [vmem:[#allocation8 + $0x60] sm:$0xff]  ;;  %v81_v6 = vld [vmem:[#allocation8 + $0x58] sm:$0xff]  ;;  %vm207_vm6 = vcmask 130112   ;;  %vm210_vm7 = vcmask 122880  }
  0x12   :  { %v80_v7 = vld [vmem:[#allocation8 + $0x50] sm:$0xff]  ;;  %v79_v8 = vld [vmem:[#allocation8 + $0x48] sm:$0xff]  ;;  %v78_v9 = vld [vmem:[#allocation8 + $0x40] sm:$0xff]  ;;  %252 = vset.pattern.permute.xlu0 %v344_v34  ;;  %253 = vset.pattern.permute.xlu1 %v344_v34 }
  0x13   :  { %87 = vmatpush.msra.mxu0 %v84_v3  ;;  %231 = vmatpush.msra.mxu1 %v84_v3  ;;  %v77_v10 = vld [vmem:[#allocation8 + $0x38] sm:$0xff]  ;;  %v76_v11 = vld [vmem:[#allocation8 + $0x30] sm:$0xff]  ;;  %v75_v12 = vld [vmem:[#allocation8 + $0x28] sm:$0xff] }
  0x14   :  { %v74_v13 = vld [vmem:[#allocation8 + $0x20] sm:$0xff]  ;;  %v73_v14 = vld [vmem:[#allocation8 + $0x18] sm:$0xff]  ;;  %v72_v15 = vld [vmem:[#allocation8 + $0x10] sm:$0xff] }
  0x15   :  { %88 = vmatpush.msra.mxu0 %v83_v4  ;;  %232 = vmatpush.msra.mxu1 %v83_v4  ;;  %v71_v16 = vld [vmem:[#allocation8 + $0x8] sm:$0xff]  ;;  %v70_v17 = vld [vmem:[#allocation8] sm:$0xff]  ;;  %v68_v18 = vld [vmem:[#allocation5] sm:$0xff] }
  0x16   :  { %v69_v19 = vld [vmem:[#allocation5 + $0x8] sm:$0xff]  ;;  %v254_v20 = vld [vmem:[%s404_s2] ss:$0 sm:$0xff]  ;;  %v257_v61 = vld [vmem:[#allocation4] ss:$0 sm:$0xff]  ;;  %s345_s2 = smov [#allocation10]  }
  0x17   :  { %89 = vmatpush.msra.mxu0 %v82_v5  ;;  %233 = vmatpush.msra.mxu1 %v82_v5  ;;  %v255_v24 = vld [vmem:[%s405_s3] ss:$0 sm:$0xff]  ;;  %s217_s3 = sshll.u32 %s345_s2, 4  ;;  %s218_s3 = int_to_ptr.vmem [resolvable:$true] %s217_s3 }
  0x18   :  { %v256_v51 = vld [vmem:[#allocation3] ss:$0 sm:$0xff] }
  0x19   :  { %90 = vmatpush.msra.mxu0 %v81_v6  ;;  %234 = vmatpush.msra.mxu1 %v81_v6 }
  0x1b   :  { %91 = vmatpush.msra.mxu0 %v80_v7  ;;  %235 = vmatpush.msra.mxu1 %v80_v7 }
  0x1d   :  { %92 = vmatpush.msra.mxu0 %v79_v8  ;;  %236 = vmatpush.msra.mxu1 %v79_v8 }
  0x1f   :  { %93 = vmatpush.msra.mxu0 %v78_v9  ;;  %237 = vmatpush.msra.mxu1 %v78_v9 }
  0x21   :  { %94 = vmatpush.msra.mxu0 %v77_v10  ;;  %238 = vmatpush.msra.mxu1 %v77_v10 }
  0x23   :  { %95 = vmatpush.msra.mxu0 %v76_v11  ;;  %239 = vmatpush.msra.mxu1 %v76_v11  ;;  %v202_v11 = vlaneseq }
  0x25   :  { %96 = vmatpush.msra.mxu0 %v75_v12  ;;  %240 = vmatpush.msra.mxu1 %v75_v12  ;;  %v203_v12 = vand.u32 127, %v202_v11 }
  0x27   :  { %97 = vmatpush.msra.mxu0 %v74_v13  ;;  %241 = vmatpush.msra.mxu1 %v74_v13  ;;  %v205_v13 = vadd.s32 4294967288, %v203_v12 }
  0x29   :  { %98 = vmatpush.msra.mxu0 %v73_v14  ;;  %242 = vmatpush.msra.mxu1 %v73_v14 }
  0x2b   :  { %99 = vmatpush.msra.mxu0 %v72_v15  ;;  %243 = vmatpush.msra.mxu1 %v72_v15 }
  0x2d   :  { %100 = vmatpush.msra.mxu0 %v71_v16  ;;  %244 = vmatpush.msra.mxu1 %v71_v16 }
  0x2f   :  { %101 = vmatpush.msra.mxu0 %v70_v17  ;;  %245 = vmatpush.msra.mxu1 %v70_v17 }
  0x30   :  { %102 = vmatmul.f32.vlgmr.msra.gmra.mxu0 %v68_v18  ;;  %105 = vmatmul.f32.vlgmr.msra.gmra.mxu1 %v69_v19 }
  0xad   :  { %v103_v21 = vpop.f32.mrf.mxu0  ;;  %v106_v22 = vpop.f32.mrf.mxu1 }
  0xae   :  { %v122_v23 = vadd.f32 %v254_v20, %v103_v21  ;;  %v123_v26 = vadd.f32 %v254_v20, %v106_v22 }
  0xb0   :  { %v124_v25 = vmax.f32 %v122_v23, 0.0  ;;  %v125_v29 = vmax.f32 %v123_v26, 0.0 }
  0xb2   :  { %126 = vadd.xlane.f32.xlu0 %v124_v25  ;;  %v150_v27 = vmul.f32 %v255_v24, %v124_v25  ;;  %v132_v28 = vmul.f32 %v124_v25, %v124_v25  ;;  %v151_v30 = vmul.f32 %v255_v24, %v125_v29  ;;  %v133_v31 = vmul.f32 %v125_v29, %v125_v29 }
  0xb4   :  { %152 = vadd.xlane.f32.xlu2 %v150_v27  ;;  %134 = vadd.xlane.f32.xlu1 %v132_v28 }
  0xba   :  { %128 = vadd.xlane.f32.xlu0 %v125_v29 }
  0xbc   :  { %154 = vadd.xlane.f32.xlu2 %v151_v30  ;;  %136 = vadd.xlane.f32.xlu1 %v133_v31 }
 0x125   :  { %v127_v32 = vpop.xlane.xlu0 %126 }
 0x126   :  { %v130_v33 = vmul.f32 0.015625, %v127_v32 }
 0x127   :  { %v135_v35 = vpop.xlane.xlu1 %134  ;;  %v153_v56 = vpop.xlane.xlu2 %152 }
 0x128   :  { %v140_v36 = vmul.f32 %v130_v33, %v130_v33  ;;  %v138_v37 = vmul.f32 0.015625, %v135_v35  ;;  %v160_v54 = vmul.f32 %v256_v51, %v130_v33 }
 0x12a   :  { %v142_v38 = vsub.f32 %v138_v37, %v140_v36  ;;  %v162_v59 = vsub.f32 %v153_v56, %v160_v54 }
 0x12c   :  { %v144_v39 = vmax.f32 %v142_v38, 0.0 }
 0x12d   :  { %v129_v40 = vpop.xlane.xlu0 %128 }
 0x12e   :  { %v164_v41 = vadd.f32 1e-05, %v144_v39  ;;  %v131_v42 = vmul.f32 0.015625, %v129_v40 }
 0x12f   :  { %v137_v43 = vpop.xlane.xlu1 %136  ;;  %v155_v5 = vpop.xlane.xlu2 %154 }
 0x130   :  { %258 = vrsqrt.f32 %v164_v41  ;;  %v141_v44 = vmul.f32 %v131_v42, %v131_v42  ;;  %v139_v45 = vmul.f32 0.015625, %v137_v43  ;;  %vm172_vm1 = vweird.f32 %v164_v41 }
 0x131   :  { %v161_v3 = vmul.f32 %v256_v51, %v131_v42 }
 0x132   :  { %v143_v46 = vsub.f32 %v139_v45, %v141_v44 }
 0x133   :  { %v163_v7 = vsub.f32 %v155_v5, %v161_v3 }
 0x134   :  { %v145_v47 = vmax.f32 %v143_v46, 0.0 }
 0x136   :  { %v259_v48 = vpop.eup %258  ;;  %v165_v50 = vadd.f32 1e-05, %v145_v47 }
 0x137   :  { %v167_v49 = vmul.f32 %v259_v48, %v164_v41  ;;  %vm173_vm0 = vweird.f32 %v259_v48 }
 0x138   :  { %260 = vrsqrt.f32 %v165_v50  ;;  %vm174_vm2 = vmor %vm172_vm1, %vm173_vm0  ;;  %vm182_vm4 = vweird.f32 %v165_v50 }
 0x139   :  { %v168_v52 = vmul.f32 %v259_v48, %v167_v49 }
 0x13b   :  { %v169_v53 = vmul.f32 0.5, %v168_v52 }
 0x13d   :  { %v170_v55 = vsub.f32 1.5, %v169_v53 }
 0x13e   :  { %v261_v57 = vpop.eup %260 }
 0x13f   :  { %v171_v58 = vmul.f32 %v259_v48, %v170_v55  ;;  %v177_v60 = vmul.f32 %v261_v57, %v165_v50  ;;  %vm183_vm3 = vweird.f32 %v261_v57 }
 0x140   :  { %vm184_vm5 = vmor %vm182_vm4, %vm183_vm3 }
 0x141   :  { %v175_v62 = vsel %vm174_vm2, %v259_v48, %v171_v58  ;;  %v178_v63 = vmul.f32 %v261_v57, %v177_v60 }
 0x142   :  { %v186_v0 = vmul.f32 %v175_v62, %v162_v59 }
 0x143   :  { %v179_v1 = vmul.f32 0.5, %v178_v63 }
 0x144   :  { %v192_v2 = vadd.f32 %v257_v61, %v186_v0 }
 0x145   :  { %v180_v4 = vsub.f32 1.5, %v179_v1 }
 0x146   :  { %197 = vperm.xlu0 %252, %v192_v2  }
 0x147   :  { %v181_v6 = vmul.f32 %v261_v57, %v180_v4 }
 0x149   :  { %v185_v8 = vsel %vm184_vm5, %v261_v57, %v181_v6 }
 0x14a   :  { %v187_v9 = vmul.f32 %v185_v8, %v163_v7 }
 0x14c   :  { %v193_v10 = vadd.f32 %v257_v61, %v187_v9 }
 0x14e   :  { %200 = vperm.xlu1 %253, %v193_v10  }
 0x1b8   :  { %v198_v14 = vpop.permute.xlu0 %197 }
 0x1b9   :  { %v204_v16 = vperm.slane %v198_v14, %v203_v12 }
 0x1c0   :  { %v201_v15 = vpop.permute.xlu1 %200 }
 0x1c1   :  { %v206_v17 = vperm.slane %v201_v15, %v205_v13 }
 0x1c3   :  { %v208_v18 = vsel %vm207_vm6, %v206_v17, %v204_v16 }
 0x1c4   :  { %211 = vst.msk [vmem:[#allocation10] sm:$0x1] %vm210_vm7, %v208_v18 }
 0x1c5   :  { %222 = dma.vmem_to_hbm [thread:$0]  %s218_s3, 16, %s220_s15, [#allocation7]  }
 0x1c6   :  { %338 = dma.done.wait [#allocation7], 16  }
 0x1c7   :  { %339 = vsyncadd [#allocation7], 4294967280 }
 0x1c8   :  { %227 = vsyncpa [#allocation6], 1 }
 0x1c9   :  { %228 = vsyncpa [#allocation9], 1 }
 0x1ca   :  { %229 = vsyncpa [#allocation7], 1 }

// kernel: tpu_custom_call.1
= control target key start
LH: loop header
LB: loop body
LE: loop exit
PB: predicated region body
PF: predicated region fallthrough
CT: control target
= control target key end

     0   :  { %s402_s0 = inlined_call_operand.hbm [shape: f32[16,128], index: 0, kind: input, shape index: {}]   ;;  %s403_s1 = inlined_call_operand.hbm [shape: f32[128,128], index: 1, kind: input, shape index: {}]   ;;  %s404_s2 = inlined_call_operand.vmem [shape: f32[1,128], index: 2, kind: input, shape index: {}]   ;;  %s405_s3 = inlined_call_operand.vmem [shape: f32[1,128], index: 3, kind: input, shape index: {}]   ;;  %s406_s4 = inlined_call_operand.<no memory space> [shape: f32[1,1], index: 4, kind: input, shape index: {}]   ;;  %s407_s6 = inlined_call_operand.hbm [shape: f32[1,1,16], index: 6, kind: output, shape index: {}]   ;;  %s408_s5 = inlined_call_operand.<no memory space> [shape: f32[1,1], index: 5, kind: input, shape index: {}]  }
   0x1   :  { %v11_v0 = vstv %s406_s4  ;;  %v13_v1 = vstv %s408_s5 }
   0x2   :  { %12 = vst [vmem:[#allocation3] sm:$0x1] %v11_v0 }
   0x3   :  { %14 = vst [vmem:[#allocation4] sm:$0x1] %v13_v1 }
   0x4   :  { %15 = vsyncpa [#allocation6], 0 }
   0x5   :  { %16 = vsyncpa [#allocation9], 0 }
   0x6   :  { %17 = vsyncpa [#allocation7], 0  ;;  %s22_s27 = sshll.u32 %s402_s0, 4  ;;  %s340_s28 = smov [#allocation5]   ;;  %s23_s27 = int_to_ptr.hbm [resolvable:$true] %s22_s27 }
   0x7   :  { %s24_s29 = sshll.u32 %s340_s28, 4  ;;  %s35_s4 = sshll.u32 %s403_s1, 4  ;;  %s25_s29 = int_to_ptr.vmem [resolvable:$true] %s24_s29  ;;  %s36_s4 = int_to_ptr.hbm [resolvable:$true] %s35_s4 }
   0x8   :  { %s341_s8 = smov 128   ;;  %s342_s9 = smov 8  }
   0x9   :  { %30 = dma.hbm_to_vmem [thread:$0]  %s23_s27, 256, %s25_s29, [#allocation6], %s341_s8, %s341_s8, %s342_s9  }
   0xa   :  { %s343_s5 = smov [#allocation8]  }
   0xb   :  { %s37_s10 = sshll.u32 %s343_s5, 4  ;;  %s38_s10 = int_to_ptr.vmem [resolvable:$true] %s37_s10 }
   0xc   :  { %43 = dma.hbm_to_vmem [thread:$0]  %s36_s4, 2048, %s38_s10, [#allocation9], %s341_s8, %s341_s8, %s342_s9  }
   0xd   :  { %334 = dma.done.wait [#allocation6], 256  }
   0xe   :  { %335 = vsyncadd [#allocation6], 4294967040 }
   0xf   :  { %336 = dma.done.wait [#allocation9], 2048  }
  0x10   :  { %337 = vsyncadd [#allocation9], 4294965248  ;;  %v85_v2 = vld [vmem:[#allocation8 + $0x78] sm:$0xff]  ;;  %v84_v3 = vld [vmem:[#allocation8 + $0x70] sm:$0xff]  ;;  %v344_v34 = vmov 0   ;;  %s219_s15 = sshll.u32 %s407_s6, 4  ;;  %s220_s15 = int_to_ptr.hbm [resolvable:$true] %s219_s15 }
  0x11   :  { %86 = vmatpush.msra.mxu0 %v85_v2  ;;  %230 = vmatpush.msra.mxu1 %v85_v2  ;;  %v83_v4 = vld [vmem:[#allocation8 + $0x68] sm:$0xff]  ;;  %v82_v5 = vld [vmem:[#allocation8 + $0x60] sm:$0xff]  ;;  %v81_v6 = vld [vmem:[#allocation8 + $0x58] sm:$0xff]  ;;  %vm207_vm6 = vcmask 130112   ;;  %vm210_vm7 = vcmask 122880  }
  0x12   :  { %v80_v7 = vld [vmem:[#allocation8 + $0x50] sm:$0xff]  ;;  %v79_v8 = vld [vmem:[#allocation8 + $0x48] sm:$0xff]  ;;  %v78_v9 = vld [vmem:[#allocation8 + $0x40] sm:$0xff]  ;;  %252 = vset.pattern.permute.xlu0 %v344_v34  ;;  %253 = vset.pattern.permute.xlu1 %v344_v34 }
  0x13   :  { %87 = vmatpush.msra.mxu0 %v84_v3  ;;  %231 = vmatpush.msra.mxu1 %v84_v3  ;;  %v77_v10 = vld [vmem:[#allocation8 + $0x38] sm:$0xff]  ;;  %v76_v11 = vld [vmem:[#allocation8 + $0x30] sm:$0xff]  ;;  %v75_v12 = vld [vmem:[#allocation8 + $0x28] sm:$0xff] }
  0x14   :  { %v74_v13 = vld [vmem:[#allocation8 + $0x20] sm:$0xff]  ;;  %v73_v14 = vld [vmem:[#allocation8 + $0x18] sm:$0xff]  ;;  %v72_v15 = vld [vmem:[#allocation8 + $0x10] sm:$0xff] }
  0x15   :  { %88 = vmatpush.msra.mxu0 %v83_v4  ;;  %232 = vmatpush.msra.mxu1 %v83_v4  ;;  %v71_v16 = vld [vmem:[#allocation8 + $0x8] sm:$0xff]  ;;  %v70_v17 = vld [vmem:[#allocation8] sm:$0xff]  ;;  %v68_v18 = vld [vmem:[#allocation5] sm:$0xff] }
  0x16   :  { %v69_v19 = vld [vmem:[#allocation5 + $0x8] sm:$0xff]  ;;  %v254_v20 = vld [vmem:[%s404_s2] ss:$0 sm:$0xff]  ;;  %v257_v61 = vld [vmem:[#allocation4] ss:$0 sm:$0xff]  ;;  %s345_s2 = smov [#allocation10]  }
  0x17   :  { %89 = vmatpush.msra.mxu0 %v82_v5  ;;  %233 = vmatpush.msra.mxu1 %v82_v5  ;;  %v255_v24 = vld [vmem:[%s405_s3] ss:$0 sm:$0xff]  ;;  %s217_s3 = sshll.u32 %s345_s2, 4  ;;  %s218_s3 = int_to_ptr.vmem [resolvable:$true] %s217_s3 }
  0x18   :  { %v256_v51 = vld [vmem:[#allocation3] ss:$0 sm:$0xff] }
  0x19   :  { %90 = vmatpush.msra.mxu0 %v81_v6  ;;  %234 = vmatpush.msra.mxu1 %v81_v6 }
  0x1b   :  { %91 = vmatpush.msra.mxu0 %v80_v7  ;;  %235 = vmatpush.msra.mxu1 %v80_v7 }
  0x1d   :  { %92 = vmatpush.msra.mxu0 %v79_v8  ;;  %236 = vmatpush.msra.mxu1 %v79_v8 }
  0x1f   :  { %93 = vmatpush.msra.mxu0 %v78_v9  ;;  %237 = vmatpush.msra.mxu1 %v78_v9 }
  0x21   :  { %94 = vmatpush.msra.mxu0 %v77_v10  ;;  %238 = vmatpush.msra.mxu1 %v77_v10 }
  0x23   :  { %95 = vmatpush.msra.mxu0 %v76_v11  ;;  %239 = vmatpush.msra.mxu1 %v76_v11  ;;  %v202_v11 = vlaneseq }
  0x25   :  { %96 = vmatpush.msra.mxu0 %v75_v12  ;;  %240 = vmatpush.msra.mxu1 %v75_v12  ;;  %v203_v12 = vand.u32 127, %v202_v11 }
  0x27   :  { %97 = vmatpush.msra.mxu0 %v74_v13  ;;  %241 = vmatpush.msra.mxu1 %v74_v13  ;;  %v205_v13 = vadd.s32 4294967288, %v203_v12 }
  0x29   :  { %98 = vmatpush.msra.mxu0 %v73_v14  ;;  %242 = vmatpush.msra.mxu1 %v73_v14 }
  0x2b   :  { %99 = vmatpush.msra.mxu0 %v72_v15  ;;  %243 = vmatpush.msra.mxu1 %v72_v15 }
  0x2d   :  { %100 = vmatpush.msra.mxu0 %v71_v16  ;;  %244 = vmatpush.msra.mxu1 %v71_v16 }
  0x2f   :  { %101 = vmatpush.msra.mxu0 %v70_v17  ;;  %245 = vmatpush.msra.mxu1 %v70_v17 }
  0x30   :  { %102 = vmatmul.f32.vlgmr.msra.gmra.mxu0 %v68_v18  ;;  %105 = vmatmul.f32.vlgmr.msra.gmra.mxu1 %v69_v19 }
  0xad   :  { %v103_v21 = vpop.f32.mrf.mxu0  ;;  %v106_v22 = vpop.f32.mrf.mxu1 }
  0xae   :  { %v122_v23 = vadd.f32 %v254_v20, %v103_v21  ;;  %v123_v26 = vadd.f32 %v254_v20, %v106_v22 }
  0xb0   :  { %v124_v25 = vmax.f32 %v122_v23, 0.0  ;;  %v125_v29 = vmax.f32 %v123_v26, 0.0 }
  0xb2   :  { %126 = vadd.xlane.f32.xlu0 %v124_v25  ;;  %v150_v27 = vmul.f32 %v255_v24, %v124_v25  ;;  %v132_v28 = vmul.f32 %v124_v25, %v124_v25  ;;  %v151_v30 = vmul.f32 %v255_v24, %v125_v29  ;;  %v133_v31 = vmul.f32 %v125_v29, %v125_v29 }
  0xb4   :  { %152 = vadd.xlane.f32.xlu2 %v150_v27  ;;  %134 = vadd.xlane.f32.xlu1 %v132_v28 }
  0xba   :  { %128 = vadd.xlane.f32.xlu0 %v125_v29 }
  0xbc   :  { %154 = vadd.xlane.f32.xlu2 %v151_v30  ;;  %136 = vadd.xlane.f32.xlu1 %v133_v31 }
 0x125   :  { %v127_v32 = vpop.xlane.xlu0 %126 }
 0x126   :  { %v130_v33 = vmul.f32 0.015625, %v127_v32 }
 0x127   :  { %v135_v35 = vpop.xlane.xlu1 %134  ;;  %v153_v56 = vpop.xlane.xlu2 %152 }
 0x128   :  { %v140_v36 = vmul.f32 %v130_v33, %v130_v33  ;;  %v138_v37 = vmul.f32 0.015625, %v135_v35  ;;  %v160_v54 = vmul.f32 %v256_v51, %v130_v33 }
 0x12a   :  { %v142_v38 = vsub.f32 %v138_v37, %v140_v36  ;;  %v162_v59 = vsub.f32 %v153_v56, %v160_v54 }
 0x12c   :  { %v144_v39 = vmax.f32 %v142_v38, 0.0 }
 0x12d   :  { %v129_v40 = vpop.xlane.xlu0 %128 }
 0x12e   :  { %v164_v41 = vadd.f32 1e-05, %v144_v39  ;;  %v131_v42 = vmul.f32 0.015625, %v129_v40 }
 0x12f   :  { %v137_v43 = vpop.xlane.xlu1 %136  ;;  %v155_v5 = vpop.xlane.xlu2 %154 }
 0x130   :  { %258 = vrsqrt.f32 %v164_v41  ;;  %v141_v44 = vmul.f32 %v131_v42, %v131_v42  ;;  %v139_v45 = vmul.f32 0.015625, %v137_v43  ;;  %vm172_vm1 = vweird.f32 %v164_v41 }
 0x131   :  { %v161_v3 = vmul.f32 %v256_v51, %v131_v42 }
 0x132   :  { %v143_v46 = vsub.f32 %v139_v45, %v141_v44 }
 0x133   :  { %v163_v7 = vsub.f32 %v155_v5, %v161_v3 }
 0x134   :  { %v145_v47 = vmax.f32 %v143_v46, 0.0 }
 0x136   :  { %v259_v48 = vpop.eup %258  ;;  %v165_v50 = vadd.f32 1e-05, %v145_v47 }
 0x137   :  { %v167_v49 = vmul.f32 %v259_v48, %v164_v41  ;;  %vm173_vm0 = vweird.f32 %v259_v48 }
 0x138   :  { %260 = vrsqrt.f32 %v165_v50  ;;  %vm174_vm2 = vmor %vm172_vm1, %vm173_vm0  ;;  %vm182_vm4 = vweird.f32 %v165_v50 }
 0x139   :  { %v168_v52 = vmul.f32 %v259_v48, %v167_v49 }
 0x13b   :  { %v169_v53 = vmul.f32 0.5, %v168_v52 }
 0x13d   :  { %v170_v55 = vsub.f32 1.5, %v169_v53 }
 0x13e   :  { %v261_v57 = vpop.eup %260 }
 0x13f   :  { %v171_v58 = vmul.f32 %v259_v48, %v170_v55  ;;  %v177_v60 = vmul.f32 %v261_v57, %v165_v50  ;;  %vm183_vm3 = vweird.f32 %v261_v57 }
 0x140   :  { %vm184_vm5 = vmor %vm182_vm4, %vm183_vm3 }
 0x141   :  { %v175_v62 = vsel %vm174_vm2, %v259_v48, %v171_v58  ;;  %v178_v63 = vmul.f32 %v261_v57, %v177_v60 }
 0x142   :  { %v186_v0 = vmul.f32 %v175_v62, %v162_v59 }
 0x143   :  { %v179_v1 = vmul.f32 0.5, %v178_v63 }
 0x144   :  { %v192_v2 = vadd.f32 %v257_v61, %v186_v0 }
 0x145   :  { %v180_v4 = vsub.f32 1.5, %v179_v1 }
 0x146   :  { %197 = vperm.xlu0 %252, %v192_v2  }
 0x147   :  { %v181_v6 = vmul.f32 %v261_v57, %v180_v4 }
 0x149   :  { %v185_v8 = vsel %vm184_vm5, %v261_v57, %v181_v6 }
 0x14a   :  { %v187_v9 = vmul.f32 %v185_v8, %v163_v7 }
 0x14c   :  { %v193_v10 = vadd.f32 %v257_v61, %v187_v9 }
 0x14e   :  { %200 = vperm.xlu1 %253, %v193_v10  }
 0x1b8   :  { %v198_v14 = vpop.permute.xlu0 %197 }
 0x1b9   :  { %v204_v16 = vperm.slane %v198_v14, %v203_v12 }
 0x1c0   :  { %v201_v15 = vpop.permute.xlu1 %200 }
 0x1c1   :  { %v206_v17 = vperm.slane %v201_v15, %v205_v13 }
 0x1c3   :  { %v208_v18 = vsel %vm207_vm6, %v206_v17, %v204_v16 }
 0x1c4   :  { %211 = vst.msk [vmem:[#allocation10] sm:$0x1] %vm210_vm7, %v208_v18 }
 0x1c5   :  { %222 = dma.vmem_to_hbm [thread:$0]  %s218_s3, 16, %s220_s15, [#allocation7]  }
 0x1c6   :  { %338 = dma.done.wait [#allocation7], 16  }
 0x1c7   :  { %339 = vsyncadd [#allocation7], 4294967280 }
 0x1c8   :  { %227 = vsyncpa [#allocation6], 1 }
 0x1c9   :  { %228 = vsyncpa [#allocation9], 1 }
 0x1ca   :  { %229 = vsyncpa [#allocation7], 1 }

</bundles_post_ra>
